<compile_context>
chip_gen: v7x
topology: tpu7x:2x2x1
jax: 0.10.0
libtpu: 0.0.40
codegen_flags: <defaults>
</compile_context>

<pallas_src>
import functools

import jax
import jax.numpy as jnp
from jax.experimental import pallas as pl
from jax.experimental.pallas import tpu as pltpu


def _round_up(x: int, m: int) -> int:
    return ((x + m - 1) // m) * m


def _sublane_multiple(dtype) -> int:
    # 8 sublanes of 32-bit; sub-32-bit dtypes pack along sublanes (bf16 -> 16).
    return max(8, 32 // max(1, jnp.dtype(dtype).itemsize))


def _linear_embedding_kernel(x_ref, wt_ref, b_ref, o_ref):
    # x_ref: (tm, K), wt_ref: (K, N), b_ref: (1, N), o_ref: (tm, N)
    x = x_ref[...].astype(wt_ref.dtype)  # optional bf16 operand cast, vreg-only
    y = jnp.dot(x, wt_ref[...], preferred_element_type=jnp.float32)
    y = y + b_ref[...]                   # bias add / accumulation stay f32
    o_ref[...] = y.astype(o_ref.dtype)


def linear_embedding(x, weight, bias=None, *, tile_m=None, compute_dtype=None,
                     out_dtype=None):
    """Pallas implementation of LinearEmbedding.forward / encode.

    x: (..., d), weight: (e, d), bias: (e,) or None. Returns (..., e).
    compute_dtype: optional MXU operand dtype (e.g. jnp.bfloat16). The cast
      happens inside the kernel, so no extra HBM pass; accumulation stays f32.
    out_dtype: optional output dtype (default x.dtype).
    """
    *batch, d = x.shape
    e = weight.shape[0]
    assert weight.shape == (e, d)
    if bias is not None:
        assert bias.shape == (e,)

    odt = jnp.dtype(out_dtype) if out_dtype is not None else jnp.dtype(x.dtype)
    cdt = jnp.dtype(compute_dtype) if compute_dtype is not None else jnp.dtype(x.dtype)

    xm = x.reshape(-1, d)
    M = xm.shape[0]
    if M == 0 or e == 0:
        return jnp.zeros((*batch, e), dtype=odt)

    isz_x = jnp.dtype(x.dtype).itemsize
    isz_w = cdt.itemsize
    isz_o = odt.itemsize

    # ---- block-diagonal row-fold: lane-dense x loads and output stores ------
    fold = 1
    if 0 < d < 128 and 128 % d == 0:
        f = 128 // d
        # folded weight must stay comfortably VMEM-resident
        if M % f == 0 and (f * d) * (f * e) * isz_w <= (4 << 20):
            fold = f

    K, N = fold * d, fold * e
    M_rows = M // fold
    x_in = xm.reshape(M_rows, K)  # free row-major reshape, no HBM copy pass

    # Weight / bias staging (tiny; note: re-executed on every call under jit).
    wt = jnp.transpose(weight).astype(cdt)  # (d, e): MXU-native (K on sublanes)
    if fold > 1:
        w_used = jnp.zeros((K, N), dtype=cdt)
        for j in range(fold):
            w_used = w_used.at[j * d:(j + 1) * d, j * e:(j + 1) * e].set(wt)
    else:
        w_used = wt
    if bias is not None:
        b_used = jnp.tile(bias.astype(jnp.float32), (fold,)).reshape(1, N)
    else:
        b_used = jnp.zeros((1, N), dtype=jnp.float32)

    # ---- generation-aware VMEM budget (v7x: 64 MiB/TC, v5e/v6e: 128 MiB) ----
    try:
        phys_vmem = int(pltpu.get_tpu_info().vmem_capacity_bytes)
    except Exception:
        phys_vmem = 64 * 1024 * 1024
    vmem_cap = max(16 << 20, min(phys_vmem - (16 << 20), (3 * phys_vmem) // 4))

    w_bytes = K * N * isz_w + N * 4
    if w_bytes > vmem_cap // 2:
        raise ValueError(
            "LinearEmbedding weight does not fit VMEM-resident; a K/N-tiled "
            "variant is required for this shape.")

    def vmem_est(tm, x_bufs):
        return (x_bufs * tm * K * isz_x      # x row tiles
                + 2 * tm * N * isz_o         # output tiles (double-buffered)
                + w_bytes                    # resident weight + bias
                + (2 << 20))                 # slack for compiler scratch

    # ---- row-tile selection --------------------------------------------------
    align = max(_sublane_multiple(x.dtype), _sublane_multiple(cdt))
    if M_rows <= align:
        tm = M_rows  # block == full dim: always legal
    else:
        tm = _round_up(max(int(tile_m), align), align) if tile_m is not None else 8192
        # keep >= 2 grid steps so both v7x TensorCores get row tiles
        tm = min(tm, max(align, _round_up(pl.cdiv(M_rows, 2), align)))
        tm = min(tm, _round_up(M_rows, align))
        while tm > align and vmem_est(tm, 3) > vmem_cap:
            tm = max(align, _round_up(tm // 2, align))

    n_tiles = pl.cdiv(M_rows, tm)

    # x DMAs are short vs. the output writeback at small d: give x an extra
    # pipeline stage when the grid is deep enough. Weight/bias stay resident.
    if n_tiles >= 3:
        x_spec = pl.BlockSpec((tm, K), lambda i: (i, 0),
                              pipeline_mode=pl.Buffered(3))
        x_bufs = 3
    else:
        x_spec = pl.BlockSpec((tm, K), lambda i: (i, 0))
        x_bufs = 2

    vmem_limit = int(min(vmem_cap, max(4 << 20, vmem_est(tm, x_bufs))))

    cost = pl.CostEstimate(
        flops=2 * M_rows * K * N,
        transcendentals=0,
        bytes_accessed=(M_rows * K * isz_x + K * N * isz_w + N * 4
                        + M_rows * N * isz_o),
    )

    out = pl.pallas_call(
        _linear_embedding_kernel,
        out_shape=jax.ShapeDtypeStruct((M_rows, N), odt),
        grid_spec=pltpu.PrefetchScalarGridSpec(
            num_scalar_prefetch=0,
            grid=(n_tiles,),
            in_specs=[
                x_spec,                                  # x row tile
                pl.BlockSpec((K, N), lambda i: (0, 0)),  # weight, VMEM-resident
                pl.BlockSpec((1, N), lambda i: (0, 0)),  # bias, VMEM-resident
            ],
            out_specs=pl.BlockSpec((tm, N), lambda i: (i, 0)),
        ),
        compiler_params=pltpu.CompilerParams(
            dimension_semantics=("parallel",),  # row tiles across TCs (v7x)
            vmem_limit_bytes=vmem_limit,
        ),
        cost_estimate=cost,
    )(x_in, w_used, b_used)

    # (M_rows, N) row-major-reshapes to (..., e) for free (fold or no fold).
    return out.reshape(*batch, e)


def init_linear_embedding_params(key, input_size, output_size, dtype=jnp.float32):
    """Deterministic re-implementation of reset_parameters():
    weight, bias ~ U(-1/sqrt(input_size), 1/sqrt(input_size))."""
    assert input_size <= output_size
    bound = 1.0 / float(jnp.sqrt(jnp.asarray(input_size, dtype=jnp.float32)))
    kw, kb = jax.random.split(key)
    weight = jax.random.uniform(
        kw, (output_size, input_size), dtype=dtype, minval=-bound, maxval=bound
    )
    bias = jax.random.uniform(
        kb, (output_size,), dtype=dtype, minval=-bound, maxval=bound
    )
    return weight, bias


if __name__ == "__main__":
    input_size = 32   # d
    output_size = 64  # e
    batch, seq = 2, 8

    key = jax.random.PRNGKey(0)
    k_param, k_x, k_x2, k_x3 = jax.random.split(key, 4)

    weight, bias = init_linear_embedding_params(k_param, input_size, output_size)
    x = jax.random.normal(k_x, (batch, seq, input_size), dtype=jnp.float32)

    fwd = jax.jit(linear_embedding)

    # f32 path (block-diagonal row-fold: K=128, N=256) — exact reference check.
    y = jax.block_until_ready(fwd(x, weight, bias))
    y_ref = x @ weight.T + bias
    assert y.shape == (batch, seq, output_size)
    assert jnp.allclose(y, y_ref, atol=1e-5, rtol=1e-5)

    # Multi-tile grid with a ragged last row tile (no input padding copy).
    x2 = jax.random.normal(k_x2, (4, 500, input_size), dtype=jnp.float32)
    y2 = jax.block_until_ready(fwd(x2, weight, bias))
    assert jnp.allclose(y2, x2 @ weight.T + bias, atol=1e-5, rtol=1e-5)

    # Fallback path (M not divisible by the fold) + no-bias variant.
    x3 = jax.random.normal(k_x3, (3, 5, input_size), dtype=jnp.float32)
    y3 = jax.block_until_ready(fwd(x3, weight, None))
    assert jnp.allclose(y3, x3 @ weight.T, atol=1e-5, rtol=1e-5)

    # bf16-operand path (cast in-kernel, f32 accumulation) — loose tolerance.
    fwd_bf16 = jax.jit(functools.partial(linear_embedding, compute_dtype=jnp.bfloat16))
    y_bf16 = jax.block_until_ready(fwd_bf16(x, weight, bias))
    assert y_bf16.shape == (batch, seq, output_size)
    assert jnp.allclose(y_bf16, y_ref, atol=2e-2, rtol=2e-2)

    print("KERNEL_OK")
</pallas_src>

<mosaic_0001>
module attributes {stable_mosaic.version = 11 : i64} {
  func.func @_linear_embedding_kernel(%arg0: i32, %arg1: memref<4x128xf32, #tpu.memory_space<vmem>>, %arg2: memref<128x256xf32, #tpu.memory_space<vmem>>, %arg3: memref<1x256xf32, #tpu.memory_space<vmem>>, %arg4: memref<4x256xf32, #tpu.memory_space<vmem>>) attributes {dimension_semantics = [#tpu.dimension_semantics<parallel>], iteration_bounds = array<i64: 1>, scalar_prefetch = 0 : i64, scratch_operands = 0 : i64, tpu.core_type = #tpu.core_type<tc>, window_params = [{transform_indices = @transform_0, window_bounds = array<i64: 4, 128>}, {pipeline_mode = #tpu.pipeline_mode<synchronous>, transform_indices = @transform_1, window_bounds = array<i64: 128, 256>}, {pipeline_mode = #tpu.pipeline_mode<synchronous>, transform_indices = @transform_2, window_bounds = array<i64: 1, 256>}, {transform_indices = @transform_3, window_bounds = array<i64: 4, 256>}]} {
    %c0 = arith.constant 0 : index
    %c0_0 = arith.constant 0 : index
    %0 = vector.load %arg1[%c0, %c0_0] : memref<4x128xf32, #tpu.memory_space<vmem>>, vector<4x128xf32>
    %c0_1 = arith.constant 0 : index
    %c0_2 = arith.constant 0 : index
    %1 = vector.load %arg2[%c0_1, %c0_2] : memref<128x256xf32, #tpu.memory_space<vmem>>, vector<128x256xf32>
    %cst = arith.constant dense<0.000000e+00> : vector<4x256xf32>
    %2 = tpu.matmul %0, %1, %cst {dimension_numbers = #tpu.dot_dimension_numbers<[1], [0], [0], [1], [0, 0, 1, 1], [], []>} : vector<4x128xf32>, vector<128x256xf32>, vector<4x256xf32> -> vector<4x256xf32>
    %c0_3 = arith.constant 0 : index
    %c0_4 = arith.constant 0 : index
    %3 = vector.load %arg3[%c0_3, %c0_4] : memref<1x256xf32, #tpu.memory_space<vmem>>, vector<1x256xf32>
    %4 = vector.broadcast %3 : vector<1x256xf32> to vector<4x256xf32>
    %5 = arith.addf %2, %4 : vector<4x256xf32>
    %c0_5 = arith.constant 0 : index
    %c0_6 = arith.constant 0 : index
    %6 = vector.load %arg4[%c0_5, %c0_6] : memref<4x256xf32, #tpu.memory_space<vmem>>, vector<4x256xf32>
    tpu.vector_store %arg4[%c0_5, %c0_6], %5 {strides = array<i32>} : memref<4x256xf32, #tpu.memory_space<vmem>>, vector<4x256xf32>,
    return
  }
  func.func @transform_0(%arg0: i32) -> (i32, i32) {
    %c0_i32 = arith.constant 0 : i32
    %c0_i32_0 = arith.constant 0 : i32
    return %arg0, %c0_i32 : i32, i32
  }
  func.func @transform_1(%arg0: i32) -> (i32, i32) {
    %c0_i32 = arith.constant 0 : i32
    %c0_i32_0 = arith.constant 0 : i32
    %c0_i32_1 = arith.constant 0 : i32
    return %c0_i32, %c0_i32_0 : i32, i32
  }
  func.func @transform_2(%arg0: i32) -> (i32, i32) {
    %c0_i32 = arith.constant 0 : i32
    %c0_i32_0 = arith.constant 0 : i32
    %c0_i32_1 = arith.constant 0 : i32
    return %c0_i32, %c0_i32_0 : i32, i32
  }
  func.func @transform_3(%arg0: i32) -> (i32, i32) {
    %c0_i32 = arith.constant 0 : i32
    %c0_i32_0 = arith.constant 0 : i32
    return %arg0, %c0_i32 : i32, i32
  }
}

</mosaic_0001>

<bundles_post_ra>
// kernel: tile.8
= control target key start
LH: loop header
LB: loop body
LE: loop exit
PB: predicated region body
PF: predicated region fallthrough
CT: control target
= control target key end

     0   :  { %s22_s0 = inlined_call_operand.vmem [shape: f32[64], index: 0, kind: input, shape index: {}]   ;;  %s23_s1 = inlined_call_operand.vmem [shape: f32[4,64], index: 1, kind: output, shape index: {}]  }
   0x1   :  { %v4_v0 = vld [vmem:[%s22_s0] ss:$0 sm:$0xff] }
   0x2   :  { %5 = vst [vmem:[%s23_s1] sm:$0xf] %v4_v0 }

// kernel: tile.9
= control target key start
LH: loop header
LB: loop body
LE: loop exit
PB: predicated region body
PF: predicated region fallthrough
CT: control target
= control target key end

     0   :  { %s6_s8 = smov 3  ;;  %vm8_vm0 = vcmask 523264   ;;  %s30_s9 = smov 64   ;;  %vm15_vm1 = vcmask 1048064   ;;  %s50_s0 = inlined_call_operand.vmem [shape: f32[4,64], index: 0, kind: input, shape index: {}]   ;;  %s51_s1 = inlined_call_operand.vmem [shape: f32[1,256], index: 1, kind: output, shape index: {}]  }
   0x1   :  { %v4_v0 = vld [vmem:[%s50_s0] sm:$0xf]  ;;  %s11_s0 = smov 3 }
   0x2   :  { %5 = vst [vmem:[#allocation1] sm:$0xf] %v4_v0 }
   0x9   :  { %v12_v1 = vld [vmem:[#allocation1 + $0x1] ss:$2 sm:%s11_s0]   ;;  %v7_v2 = vld [vmem:[#allocation1] ss:$2 sm:%s6_s8]  }
   0xa   :  { %13 = vrot.lane.b32.xlu0 %v12_v1, %s30_s9  ;;  %9 = vst.msk [vmem:[#allocation0] ss:$8 sm:$0x3] %vm8_vm0, %v7_v2  }
  0x7c   :  { %v14_v3 = vpop.permute.xlu0 %13  }
  0x7d   :  { %16 = vst.msk [vmem:[#allocation0] ss:$8 sm:$0x3] %vm15_vm1, %v14_v3  }
  0x84   :  { %v20_v4 = vld [vmem:[#allocation0] sm:$0x1]  ;;  %v24_v5 = vld [vmem:[#allocation0 + $0x8] sm:$0x1] }
  0x85   :  { %22 = vst [vmem:[%s51_s1] sm:$0x1] %v20_v4  ;;  %28 = vst [vmem:[%s51_s1 + $0x1] sm:$0x1] %v24_v5 }

// kernel: linear_embedding.1
= control target key start
LH: loop header
LB: loop body
LE: loop exit
PB: predicated region body
PF: predicated region fallthrough
CT: control target
= control target key end

     0   :  { %v172_v3 = vmov 0.0   ;;  %v49_v50 = vlaneseq  ;;  %s298_s1 = inlined_call_operand.vmem [shape: f32[128,256], index: 1, kind: input, shape index: {}]   ;;  %s299_s0 = inlined_call_operand.vmem [shape: f32[4,128], index: 0, kind: input, shape index: {}]   ;;  %s300_s2 = inlined_call_operand.vmem [shape: f32[1,256], index: 2, kind: input, shape index: {}]   ;;  %s301_s3 = inlined_call_operand.vmem [shape: f32[4,256], index: 3, kind: output, shape index: {}]  }
   0x1   :  { %v16_v0 = vld [vmem:[%s298_s1 + $0x8] sm:$0xff]  ;;  %v18_v1 = vld [vmem:[%s298_s1 + $0x18] sm:$0xff]  ;;  %v15_v2 = vld [vmem:[%s298_s1] sm:$0xff]  ;;  %123 = vmatprep.mubr.f32.mxu0 %v172_v3 }
   0x2   :  { %v139_v4 = vpack.c.bf16 %v18_v1, %v16_v0  ;;  %v17_v5 = vld [vmem:[%s298_s1 + $0x10] sm:$0xff]  ;;  %v20_v6 = vld [vmem:[%s298_s1 + $0x28] sm:$0xff]  ;;  %v22_v7 = vld [vmem:[%s298_s1 + $0x38] sm:$0xff]  ;;  %v50_v51 = vshrl.u32 %v49_v50, 7 }
   0x3   :  { %v141_v8 = vpack.c.bf16 %v17_v5, %v15_v2  ;;  %v143_v9 = vpack.c.bf16 %v22_v7, %v20_v6  ;;  %v19_v10 = vld [vmem:[%s298_s1 + $0x20] sm:$0xff]  ;;  %v21_v11 = vld [vmem:[%s298_s1 + $0x30] sm:$0xff]  ;;  %v24_v12 = vld [vmem:[%s298_s1 + $0x48] sm:$0xff] }
   0x4   :  { %140 = vmatprep.subr.bf16.mxu0 %v139_v4  ;;  %v26_v13 = vld [vmem:[%s298_s1 + $0x58] sm:$0xff]  ;;  %v145_v14 = vpack.c.bf16 %v21_v11, %v19_v10  ;;  %v23_v16 = vld [vmem:[%s298_s1 + $0x40] sm:$0xff]  ;;  %v25_v17 = vld [vmem:[%s298_s1 + $0x50] sm:$0xff]  ;;  %v51_v52 = vsub.s32 0, %v50_v51  ;;  %v55_v54 = vsub.s32 1, %v50_v51 }
   0x5   :  { %142 = vmatpush1.bf16.msra.mxu0 %v141_v8  ;;  %v147_v15 = vpack.c.bf16 %v26_v13, %v24_v12  ;;  %v28_v18 = vld [vmem:[%s298_s1 + $0x68] sm:$0xff]  ;;  %v30_v19 = vld [vmem:[%s298_s1 + $0x78] sm:$0xff]  ;;  %v149_v20 = vpack.c.bf16 %v25_v17, %v23_v16  ;;  %v27_v22 = vld [vmem:[%s298_s1 + $0x60] sm:$0xff] }
   0x6   :  { %144 = vmatprep.subr.bf16.mxu0 %v143_v9  ;;  %v151_v21 = vpack.c.bf16 %v30_v19, %v28_v18  ;;  %v29_v23 = vld [vmem:[%s298_s1 + $0x70] sm:$0xff]  ;;  %v32_v24 = vld [vmem:[%s298_s1 + $0x88] sm:$0xff]  ;;  %v34_v25 = vld [vmem:[%s298_s1 + $0x98] sm:$0xff] }
   0x7   :  { %v153_v26 = vpack.c.bf16 %v29_v23, %v27_v22  ;;  %v155_v27 = vpack.c.bf16 %v34_v25, %v32_v24  ;;  %v31_v28 = vld [vmem:[%s298_s1 + $0x80] sm:$0xff]  ;;  %v33_v29 = vld [vmem:[%s298_s1 + $0x90] sm:$0xff]  ;;  %v36_v30 = vld [vmem:[%s298_s1 + $0xa8] sm:$0xff] }
   0x8   :  { %v38_v31 = vld [vmem:[%s298_s1 + $0xb8] sm:$0xff]  ;;  %v157_v32 = vpack.c.bf16 %v33_v29, %v31_v28  ;;  %v35_v34 = vld [vmem:[%s298_s1 + $0xa0] sm:$0xff]  ;;  %v37_v35 = vld [vmem:[%s298_s1 + $0xb0] sm:$0xff] }
   0x9   :  { %146 = vmatpush1.bf16.msra.mxu0 %v145_v14  ;;  %v159_v33 = vpack.c.bf16 %v38_v31, %v36_v30  ;;  %v40_v36 = vld [vmem:[%s298_s1 + $0xc8] sm:$0xff]  ;;  %v42_v37 = vld [vmem:[%s298_s1 + $0xd8] sm:$0xff]  ;;  %v161_v38 = vpack.c.bf16 %v37_v35, %v35_v34  ;;  %v39_v40 = vld [vmem:[%s298_s1 + $0xc0] sm:$0xff] }
   0xa   :  { %148 = vmatprep.subr.bf16.mxu0 %v147_v15  ;;  %v163_v39 = vpack.c.bf16 %v42_v37, %v40_v36  ;;  %v41_v41 = vld [vmem:[%s298_s1 + $0xd0] sm:$0xff]  ;;  %v44_v42 = vld [vmem:[%s298_s1 + $0xe8] sm:$0xff]  ;;  %v46_v43 = vld [vmem:[%s298_s1 + $0xf8] sm:$0xff] }
   0xb   :  { %v165_v44 = vpack.c.bf16 %v41_v41, %v39_v40  ;;  %v167_v45 = vpack.c.bf16 %v46_v43, %v44_v42  ;;  %v43_v46 = vld [vmem:[%s298_s1 + $0xe0] sm:$0xff]  ;;  %v45_v47 = vld [vmem:[%s298_s1 + $0xf0] sm:$0xff] }
   0xc   :  { %v169_v48 = vpack.c.bf16 %v45_v47, %v43_v46  ;;  %v14_v49 = vld [vmem:[%s299_s0] sm:$0xf] }
   0xd   :  { %150 = vmatpush1.bf16.msra.mxu0 %v149_v20  ;;  %v47_v53 = vld [vmem:[%s300_s2] sm:$0x3] }
   0xe   :  { %152 = vmatprep.subr.bf16.mxu0 %v151_v21  ;;  %v52_v55 = vrot.slane %v47_v53, %v51_v52  ;;  %v56_v56 = vrot.slane %v47_v53, %v55_v54 }
  0x11   :  { %154 = vmatpush1.bf16.msra.mxu0 %v153_v26 }
  0x12   :  { %156 = vmatprep.subr.bf16.mxu0 %v155_v27 }
  0x15   :  { %158 = vmatpush1.bf16.msra.mxu0 %v157_v32 }
  0x16   :  { %160 = vmatprep.subr.bf16.mxu0 %v159_v33 }
  0x19   :  { %162 = vmatpush1.bf16.msra.mxu0 %v161_v38 }
  0x1a   :  { %164 = vmatprep.subr.bf16.mxu0 %v163_v39 }
  0x1d   :  { %166 = vmatpush1.bf16.msra.mxu0 %v165_v44 }
  0x1e   :  { %168 = vmatprep.subr.bf16.mxu0 %v167_v45 }
  0x21   :  { %170 = vmatpush1.bf16.msra.mxu0 %v169_v48 }
  0x24   :  { %124 = vmatmul.mubr.f32.vlgmr.msra.gmra.mrb[0].mxu0 %v14_v49 }
  0xf7   :  { %v125_v57 = vpop.f32.mrb[0].mxu0 }
  0xf8   :  { %v126_v58 = vadd.f32 %v125_v57, %v52_v55  ;;  %v127_v59 = vpop.f32.mrb[1].mxu0 }
  0xf9   :  { %v128_v60 = vadd.f32 %v127_v59, %v56_v56 }
  0xfb   :  { %v132_v61 = vcombine.low %v126_v58, %v128_v60 }
  0xfd   :  { %134 = vst [vmem:[%s301_s3] sm:$0xff] %v132_v61 }

</bundles_post_ra>
